<compile_context>
chip_gen: v7x
topology: tpu7x:2x2x1
jax: 0.10.0
libtpu: 0.0.40
codegen_flags: <defaults>
</compile_context>

<pallas_src>
import functools

import jax
import jax.numpy as jnp
from jax.experimental import pallas as pl
from jax.experimental.pallas import tpu as pltpu


def _round_up(x, m):
    return -(-x // m) * m


def _ce_kernel(logits_ref, tgt_ref, sum_ref, cnt_ref, *,
               ignore_index, hw, tile_p, num_classes,
               n_p_per_split, n_p_total, needs_tail_mask):
    """One (split s, batch n, pixel-tile p) grid step.

    logits_ref: (1, C, TILE_P)  -- classes on sublanes, pixels on lanes
    tgt_ref:    (1, 1, TILE_P)  int32 target class per pixel
    sum_ref:    (1, 1, TILE_P)  f32 per-lane loss accumulator (resident over p)
    cnt_ref:    (1, 1, TILE_P)  f32 per-lane valid-pixel-count accumulator
    """
    s = pl.program_id(0)
    p = pl.program_id(2)
    g = s * n_p_per_split + p                     # global pixel-tile index

    @pl.when(p == 0)
    def _init():
        sum_ref[...] = jnp.zeros_like(sum_ref)
        cnt_ref[...] = jnp.zeros_like(cnt_ref)

    logits = logits_ref[0].astype(jnp.float32)    # (C, TILE_P)
    tgt = tgt_ref[0]                              # (1, TILE_P)

    valid = tgt != ignore_index                   # (1, TILE_P)

    # Numerically stable log-sum-exp over the (sublane) class axis, per pixel.
    m = jnp.max(logits, axis=0, keepdims=True)    # (1, TILE_P)
    lse = m + jnp.log(jnp.sum(jnp.exp(logits - m), axis=0, keepdims=True))

    # Gather logits[target] via one-hot select over the class (sublane) axis.
    class_ids = jax.lax.broadcasted_iota(jnp.int32, (num_classes, tile_p), 0)
    safe_tgt = jnp.where(valid, tgt, 0)
    tgt_logit = jnp.sum(jnp.where(class_ids == safe_tgt, logits, 0.0),
                        axis=0, keepdims=True)    # (1, TILE_P)

    contrib = jnp.where(valid, lse - tgt_logit, 0.0)   # (1, TILE_P)
    vcnt = valid.astype(jnp.float32)

    if needs_tail_mask:
        # Only tiles touching (or past) the end of the pixel axis need the
        # positional mask; interior full tiles skip the iota/compare/AND work.
        is_interior = g < (n_p_total - 1)

        @pl.when(is_interior)
        def _acc_full():
            sum_ref[...] = sum_ref[...] + contrib[None]
            cnt_ref[...] = cnt_ref[...] + vcnt[None]

        @pl.when(jnp.logical_not(is_interior))
        def _acc_tail():
            lane = jax.lax.broadcasted_iota(jnp.int32, (1, tile_p), 1)
            in_range = (g * tile_p + lane) < hw
            sum_ref[...] = sum_ref[...] + jnp.where(in_range, contrib, 0.0)[None]
            cnt_ref[...] = cnt_ref[...] + jnp.where(in_range, vcnt, 0.0)[None]
    else:
        sum_ref[...] = sum_ref[...] + contrib[None]
        cnt_ref[...] = cnt_ref[...] + vcnt[None]


def cross_entropy(inputs, targets, mask=None, *, reduction="mean",
                  ignore_index=255):
    """Pallas equivalent of CrossEntropy.forward(inputs, targets, mask)."""
    N, C, H, W = inputs.shape
    HW = H * W

    t = targets.astype(jnp.int32)
    if mask is not None:
        # _targets[mask] = ignore_index
        t = jnp.where(mask, jnp.int32(ignore_index), t)

    # Free views of the NCHW layout -- no transpose, no padding HBM pass.
    logits = inputs.reshape(N, C, HW)
    t = t.reshape(N, 1, HW)

    # ---- generation-aware VMEM budget -------------------------------------
    vmem_cap = None
    try:
        vmem_cap = int(pltpu.get_tpu_info().vmem_capacity_bytes)
    except Exception:
        vmem_cap = None
    if vmem_cap is None:
        vmem_cap = 64 * 2**20          # conservative (v7x-sized) fallback
        megacore_hint = False
    else:
        megacore_hint = vmem_cap <= 64 * 2**20   # v7x-class: 2 TCs / 64 MiB

    # Working-set target: ~55% of physical VMEM, capped at 48 MiB
    # (v5e/v6e 128 MiB -> 48 MiB; v7x 64 MiB -> ~35 MiB).
    working_budget = min(int(vmem_cap * 0.55), 48 * 2**20)
    vmem_limit = int(min(vmem_cap * 0.75, working_budget + 16 * 2**20))

    # ---- pixel-tile size from the VMEM budget -----------------------------
    itemsize = jnp.dtype(inputs.dtype).itemsize
    sub = {4: 8, 2: 16, 1: 32}.get(itemsize, 8)
    rc_in = _round_up(C, sub)          # sublane-padded class rows (input dtype)
    rc_f32 = _round_up(C, 8)           # sublane-padded class rows (f32 temps)
    # Per pixel lane: 2 double-buffered input blocks + ~4 live (C, tile) f32
    # intermediates (f32 copy, exp result, one-hot iota/compare, select).
    bytes_per_lane = 2 * rc_in * itemsize + 4 * rc_f32 * 4
    cap_lanes = (working_budget // bytes_per_lane) // 128 * 128
    if cap_lanes < 128:
        # TODO(synk): vocab-scale C needs a class-axis grid with an online
        # logsumexp (running max/sum scratch) instead of one (C, tile) block.
        raise NotImplementedError(
            f"num_classes={C} too large for a single-block class reduction "
            f"within the VMEM budget ({working_budget} bytes)")

    hw128 = _round_up(HW, 128)
    if HW < 128:
        tile_p = HW                    # block equals the full (short) pixel axis
    else:
        tile_p = min(int(cap_lanes), hw128)
        if hw128 >= 256:
            # Keep >= 2 pixel tiles per image so the pipeline has something to
            # prefetch and the v7x pixel split has work for both cores.
            tile_p = min(tile_p, max(128, _round_up(pl.cdiv(hw128, 2), 128)))

    n_p_total = pl.cdiv(HW, tile_p)

    # Megacore: on v7x also split the pixel axis so both TensorCores get work
    # even when N == 1; no-op on single-TC v5e/v6e.
    n_splits = 2 if (megacore_hint and n_p_total >= 2) else 1
    n_p_per_split = pl.cdiv(n_p_total, n_splits)
    pad_tiles = (n_splits * n_p_per_split) != n_p_total
    needs_tail_mask = (HW % tile_p != 0) or pad_tiles

    if pad_tiles:
        def pix_block(s, n, p):
            # Clamp so the DMA for the (fully masked) padded split tile stays
            # in bounds; the kernel discards it via the positional mask.
            return jnp.minimum(s * n_p_per_split + p, n_p_total - 1)
    else:
        def pix_block(s, n, p):
            return s * n_p_per_split + p

    kernel = functools.partial(
        _ce_kernel, ignore_index=ignore_index, hw=HW, tile_p=tile_p,
        num_classes=C, n_p_per_split=n_p_per_split, n_p_total=n_p_total,
        needs_tail_mask=needs_tail_mask)

    # TODO(synk): on v5e, sweep pipeline_mode=pl.Buffered(3) on the logits
    # in_spec if profiling shows exposed (strided) DMA.
    # TODO(synk): for small fixed C (<8) on v7x, a one-time re-layout folding
    # pixels onto sublanes would recover EUP exp throughput; skipped while the
    # kernel stays HBM-bound.
    sum_parts, cnt_parts = pl.pallas_call(
        kernel,
        out_shape=(jax.ShapeDtypeStruct((n_splits * N, 1, tile_p), jnp.float32),
                   jax.ShapeDtypeStruct((n_splits * N, 1, tile_p), jnp.float32)),
        grid_spec=pltpu.PrefetchScalarGridSpec(
            num_scalar_prefetch=0,
            grid=(n_splits, N, n_p_per_split),
            in_specs=[
                pl.BlockSpec((1, C, tile_p),
                             lambda s, n, p: (n, 0, pix_block(s, n, p))),
                pl.BlockSpec((1, 1, tile_p),
                             lambda s, n, p: (n, 0, pix_block(s, n, p))),
            ],
            out_specs=(
                pl.BlockSpec((1, 1, tile_p), lambda s, n, p: (s * N + n, 0, 0)),
                pl.BlockSpec((1, 1, tile_p), lambda s, n, p: (s * N + n, 0, 0)),
            ),
        ),
        compiler_params=pltpu.CompilerParams(
            dimension_semantics=("parallel", "parallel", "arbitrary"),
            vmem_limit_bytes=vmem_limit),
    )(logits, t)

    loss_sum = jnp.sum(sum_parts)
    valid_cnt = jnp.sum(cnt_parts)

    if reduction == "mean":
        return loss_sum / valid_cnt      # NaN when no valid pixels (matches torch)
    elif reduction == "sum":
        return loss_sum
    else:
        # TODO(synk): reduction='none' would need a per-pixel output slab.
        raise NotImplementedError(f"reduction={reduction!r} not supported")


def _reference(inputs, targets, mask=None, ignore_index=255):
    """Pure-JAX reference for correctness check."""
    N, C, H, W = inputs.shape
    t = targets.astype(jnp.int32)
    if mask is not None:
        t = jnp.where(mask, jnp.int32(ignore_index), t)
    logits = jnp.transpose(inputs, (0, 2, 3, 1)).reshape(-1, C).astype(jnp.float32)
    t = t.reshape(-1)
    valid = t != ignore_index
    logp = jax.nn.log_softmax(logits, axis=-1)
    nll = -jnp.take_along_axis(logp, jnp.where(valid, t, 0)[:, None], axis=-1)[:, 0]
    nll = jnp.where(valid, nll, 0.0)
    return jnp.sum(nll) / jnp.sum(valid.astype(jnp.float32))


if __name__ == "__main__":
    root = jax.random.PRNGKey(0)

    def run_case(key, N, C, H, W, use_mask):
        k1, k2, k3 = jax.random.split(key, 3)
        inputs = jax.random.normal(k1, (N, C, H, W), dtype=jnp.float32)
        targets = jax.random.randint(k2, (N, H, W), 0, C, dtype=jnp.int32)
        # sprinkle in some ignore_index labels
        targets = jnp.where(jax.random.uniform(k3, (N, H, W)) < 0.1, 255, targets)
        mask = None
        if use_mask:
            mask = jnp.zeros((N, H, W), dtype=bool).at[:, :4, :4].set(True)
        loss = cross_entropy(inputs, targets, mask,
                             reduction="mean", ignore_index=255)
        loss = jax.block_until_ready(loss)
        ref = _reference(inputs, targets, mask, ignore_index=255)
        assert jnp.allclose(loss, ref, rtol=1e-5, atol=1e-5), \
            ((N, C, H, W), loss, ref)

    keys = jax.random.split(root, 3)
    run_case(keys[0], 2, 4, 16, 16, True)    # HW multiple of 128, with mask
    run_case(keys[1], 2, 4, 15, 15, False)   # partial tail tile (HW = 225)
    run_case(keys[2], 1, 19, 7, 9, True)     # HW < 128, C not multiple of 8

    print("KERNEL_OK")
</pallas_src>

<mosaic_0001>
module attributes {stable_mosaic.version = 11 : i64} {
  func.func @_ce_kernel(%arg0: i32, %arg1: i32, %arg2: i32, %arg3: memref<1x4x128xf32, #tpu.memory_space<vmem>>, %arg4: memref<1x1x128xi32, #tpu.memory_space<vmem>>, %arg5: memref<1x1x128xf32, #tpu.memory_space<vmem>>, %arg6: memref<1x1x128xf32, #tpu.memory_space<vmem>>) attributes {dimension_semantics = [#tpu.dimension_semantics<parallel>, #tpu.dimension_semantics<parallel>, #tpu.dimension_semantics<arbitrary>], iteration_bounds = array<i64: 1, 2, 2>, scalar_prefetch = 0 : i64, scratch_operands = 0 : i64, tpu.core_type = #tpu.core_type<tc>, window_params = [{transform_indices = @transform_0, window_bounds = array<i64: 1, 4, 128>}, {transform_indices = @transform_1, window_bounds = array<i64: 1, 1, 128>}, {transform_indices = @transform_2, window_bounds = array<i64: 1, 1, 128>}, {transform_indices = @transform_3, window_bounds = array<i64: 1, 1, 128>}]} {
    %c0_i32 = arith.constant 0 : i32
    %0 = arith.cmpi eq, %arg2, %c0_i32 : i32
    %1 = arith.extui %0 : i1 to i32
    %c0_i32_0 = arith.constant 0 : i32
    %2 = arith.cmpi ne, %1, %c0_i32_0 : i32
    scf.if %2 {
      %cst_23 = arith.constant 0.000000e+00 : f32
      %40 = vector.broadcast %cst_23 : f32 to vector<1x1x128xf32>
      %c0_24 = arith.constant 0 : index
      %c0_25 = arith.constant 0 : index
      %c0_26 = arith.constant 0 : index
      %41 = vector.load %arg5[%c0_24, %c0_25, %c0_26] : memref<1x1x128xf32, #tpu.memory_space<vmem>>, vector<1x1x128xf32>
      tpu.vector_store %arg5[%c0_24, %c0_25, %c0_26], %40 {strides = array<i32>} : memref<1x1x128xf32, #tpu.memory_space<vmem>>, vector<1x1x128xf32>,
      %cst_27 = arith.constant 0.000000e+00 : f32
      %42 = vector.broadcast %cst_27 : f32 to vector<1x1x128xf32>
      %c0_28 = arith.constant 0 : index
      %c0_29 = arith.constant 0 : index
      %c0_30 = arith.constant 0 : index
      %43 = vector.load %arg6[%c0_28, %c0_29, %c0_30] : memref<1x1x128xf32, #tpu.memory_space<vmem>>, vector<1x1x128xf32>
      tpu.vector_store %arg6[%c0_28, %c0_29, %c0_30], %42 {strides = array<i32>} : memref<1x1x128xf32, #tpu.memory_space<vmem>>, vector<1x1x128xf32>,
    } else {
    }
    %c0 = arith.constant 0 : index
    %c0_1 = arith.constant 0 : index
    %c0_2 = arith.constant 0 : index
    %3 = vector.load %arg3[%c0, %c0_1, %c0_2] : memref<1x4x128xf32, #tpu.memory_space<vmem>>, vector<1x4x128xf32>
    %4 = vector.shape_cast %3 : vector<1x4x128xf32> to vector<4x128xf32>
    %c0_3 = arith.constant 0 : index
    %c0_4 = arith.constant 0 : index
    %c0_5 = arith.constant 0 : index
    %5 = vector.load %arg4[%c0_3, %c0_4, %c0_5] : memref<1x1x128xi32, #tpu.memory_space<vmem>>, vector<1x1x128xi32>
    %6 = vector.shape_cast %5 : vector<1x1x128xi32> to vector<1x128xi32>
    %c255_i32 = arith.constant 255 : i32
    %7 = vector.broadcast %c255_i32 : i32 to vector<1x128xi32>
    %8 = arith.cmpi ne, %6, %7 : vector<1x128xi32>
    %cst = arith.constant dense<0xFF800000> : vector<128xf32>
    %9 = vector.multi_reduction <maximumf>, %4, %cst [0] : vector<4x128xf32> to vector<128xf32>
    %10 = vector.shape_cast %9 : vector<128xf32> to vector<1x128xf32>
    %11 = vector.broadcast %10 : vector<1x128xf32> to vector<4x128xf32>
    %12 = arith.subf %4, %11 : vector<4x128xf32>
    %13 = math.exp %12 : vector<4x128xf32>
    %cst_6 = arith.constant dense<0.000000e+00> : vector<128xf32>
    %14 = vector.multi_reduction <add>, %13, %cst_6 [0] : vector<4x128xf32> to vector<128xf32>
    %15 = vector.shape_cast %14 : vector<128xf32> to vector<1x128xf32>
    %16 = math.log %15 : vector<1x128xf32>
    %17 = arith.addf %10, %16 : vector<1x128xf32>
    %18 = tpu.iota {dimensions = array<i32: 0>} : vector<4x128xi32>
    %c0_i32_7 = arith.constant 0 : i32
    %19 = vector.broadcast %c0_i32_7 : i32 to vector<1x128xi32>
    %20 = arith.select %8, %6, %19 : vector<1x128xi1>, vector<1x128xi32>
    %21 = vector.broadcast %20 : vector<1x128xi32> to vector<4x128xi32>
    %22 = arith.cmpi eq, %18, %21 : vector<4x128xi32>
    %cst_8 = arith.constant 0.000000e+00 : f32
    %23 = vector.broadcast %cst_8 : f32 to vector<4x128xf32>
    %24 = arith.select %22, %4, %23 : vector<4x128xi1>, vector<4x128xf32>
    %cst_9 = arith.constant dense<0.000000e+00> : vector<128xf32>
    %25 = vector.multi_reduction <add>, %24, %cst_9 [0] : vector<4x128xf32> to vector<128xf32>
    %26 = vector.shape_cast %25 : vector<128xf32> to vector<1x128xf32>
    %27 = arith.subf %17, %26 : vector<1x128xf32>
    %cst_10 = arith.constant 0.000000e+00 : f32
    %28 = vector.broadcast %cst_10 : f32 to vector<1x128xf32>
    %29 = arith.select %8, %27, %28 : vector<1x128xi1>, vector<1x128xf32>
    %30 = arith.extui %8 : vector<1x128xi1> to vector<1x128xi32>
    %31 = arith.sitofp %30 : vector<1x128xi32> to vector<1x128xf32>
    %c0_11 = arith.constant 0 : index
    %c0_12 = arith.constant 0 : index
    %c0_13 = arith.constant 0 : index
    %32 = vector.load %arg5[%c0_11, %c0_12, %c0_13] : memref<1x1x128xf32, #tpu.memory_space<vmem>>, vector<1x1x128xf32>
    %33 = vector.shape_cast %29 : vector<1x128xf32> to vector<1x1x128xf32>
    %34 = arith.addf %32, %33 : vector<1x1x128xf32>
    %c0_14 = arith.constant 0 : index
    %c0_15 = arith.constant 0 : index
    %c0_16 = arith.constant 0 : index
    %35 = vector.load %arg5[%c0_14, %c0_15, %c0_16] : memref<1x1x128xf32, #tpu.memory_space<vmem>>, vector<1x1x128xf32>
    tpu.vector_store %arg5[%c0_14, %c0_15, %c0_16], %34 {strides = array<i32>} : memref<1x1x128xf32, #tpu.memory_space<vmem>>, vector<1x1x128xf32>,
    %c0_17 = arith.constant 0 : index
    %c0_18 = arith.constant 0 : index
    %c0_19 = arith.constant 0 : index
    %36 = vector.load %arg6[%c0_17, %c0_18, %c0_19] : memref<1x1x128xf32, #tpu.memory_space<vmem>>, vector<1x1x128xf32>
    %37 = vector.shape_cast %31 : vector<1x128xf32> to vector<1x1x128xf32>
    %38 = arith.addf %36, %37 : vector<1x1x128xf32>
    %c0_20 = arith.constant 0 : index
    %c0_21 = arith.constant 0 : index
    %c0_22 = arith.constant 0 : index
    %39 = vector.load %arg6[%c0_20, %c0_21, %c0_22] : memref<1x1x128xf32, #tpu.memory_space<vmem>>, vector<1x1x128xf32>
    tpu.vector_store %arg6[%c0_20, %c0_21, %c0_22], %38 {strides = array<i32>} : memref<1x1x128xf32, #tpu.memory_space<vmem>>, vector<1x1x128xf32>,
    return
  }
  func.func @transform_0(%arg0: i32, %arg1: i32, %arg2: i32) -> (i32, i32, i32) {
    %c2_i32 = arith.constant 2 : i32
    %0 = arith.muli %arg0, %c2_i32 : i32
    %1 = arith.addi %0, %arg2 : i32
    %c0_i32 = arith.constant 0 : i32
    %c0_i32_0 = arith.constant 0 : i32
    return %arg1, %c0_i32, %1 : i32, i32, i32
  }
  func.func @transform_1(%arg0: i32, %arg1: i32, %arg2: i32) -> (i32, i32, i32) {
    %c2_i32 = arith.constant 2 : i32
    %0 = arith.muli %arg0, %c2_i32 : i32
    %1 = arith.addi %0, %arg2 : i32
    %c0_i32 = arith.constant 0 : i32
    %c0_i32_0 = arith.constant 0 : i32
    return %arg1, %c0_i32, %1 : i32, i32, i32
  }
  func.func @transform_2(%arg0: i32, %arg1: i32, %arg2: i32) -> (i32, i32, i32) {
    %c2_i32 = arith.constant 2 : i32
    %0 = arith.muli %arg0, %c2_i32 : i32
    %1 = arith.addi %0, %arg1 : i32
    %c0_i32 = arith.constant 0 : i32
    %c0_i32_0 = arith.constant 0 : i32
    %c0_i32_1 = arith.constant 0 : i32
    return %1, %c0_i32, %c0_i32_0 : i32, i32, i32
  }
  func.func @transform_3(%arg0: i32, %arg1: i32, %arg2: i32) -> (i32, i32, i32) {
    %c2_i32 = arith.constant 2 : i32
    %0 = arith.muli %arg0, %c2_i32 : i32
    %1 = arith.addi %0, %arg1 : i32
    %c0_i32 = arith.constant 0 : i32
    %c0_i32_0 = arith.constant 0 : i32
    %c0_i32_1 = arith.constant 0 : i32
    return %1, %c0_i32, %c0_i32_0 : i32, i32, i32
  }
}

</mosaic_0001>

<bundles_post_ra>
// kernel: tpu_custom_call.1
= control target key start
LH: loop header
LB: loop body
LE: loop exit
PB: predicated region body
PF: predicated region fallthrough
CT: control target
= control target key end

     0   :  { %s1209_s0 = inlined_call_operand.hbm [shape: f32[2,4,256], index: 0, kind: input, shape index: {}]   ;;  %s1210_s1 = inlined_call_operand.hbm [shape: s32[2,1,256], index: 1, kind: input, shape index: {}]   ;;  %s1211_s2 = inlined_call_operand.hbm [shape: f32[2,1,128], index: 2, kind: output, shape index: {0}]   ;;  %s1212_s3 = inlined_call_operand.hbm [shape: f32[2,1,128], index: 3, kind: output, shape index: {1}]  }
   0x1   :  { %1218 = sst [smem:[#allocation17_spill]] %s1209_s0 }
   0x2   :  { %9 = vsyncpa [#allocation3], 0 }
   0x3   :  { %11 = vsyncpa [#allocation3 + $0x1], 0 }
   0x4   :  { %12 = vsyncpa [#allocation6], 0 }
   0x5   :  { %14 = vsyncpa [#allocation6 + $0x1], 0 }
   0x6   :  { %15 = vsyncpa [#allocation4], 0 }
   0x7   :  { %17 = vsyncpa [#allocation4 + $0x1], 0 }
   0x8   :  { %18 = vsyncpa [#allocation9], 0 }
   0x9   :  { %20 = vsyncpa [#allocation9 + $0x1], 0  ;;  %s895_s12 = smov 0   ;;  %s897_s13 = smov 0  }
   0xa   :  { %s899_s14 = smov 0   ;;  %s901_s15 = smov 0  }
   0xb   :  { %s903_s16 = smov 0   ;;  %s905_s17 = smov 0  }
   0xc   :  { %s907_s18 = smov 0   ;;  %s909_s19 = smov 0  }
   0xd   :  { %s911_s20 = smov 0   ;;  %s913_s21 = smov 0  }
   0xe   :  { %s915_s22 = smov 0  }
   0xf LB: > { %1219 = sst [smem:[#allocation14_spill]] %s863_s21  ;;  %s514_s23 = sadd.s32 4294967295, %s867_s22   ;;  %s867_s22 = sphi %s915_s22, %s26_s22   ;;  %s863_s21 = sphi %s913_s21, %s1237_s21   ;;  %s859_s20 = sphi %s911_s20, %s1245_s20   ;;  %s855_s19 = sphi %s909_s19, %s1235_s19   ;;  %s851_s18 = sphi %s907_s18, %s1244_s18   ;;  %s847_s17 = sphi %s905_s17, %s1243_s17   ;;  %s843_s16 = sphi %s903_s16, %s1242_s16   ;;  %s839_s15 = sphi %s901_s15, %s1241_s15   ;;  %s835_s14 = sphi %s899_s14, %s1240_s14   ;;  %s831_s13 = sphi %s897_s13, %s1239_s13   ;;  %s827_s12 = sphi %s895_s12, %s1238_s12  }
  0x10   : > { %s515_s24 = sadd.s32 4294967294, %s867_s22   ;;  %s38_s25 = sadd.s32 1, %s859_s20 }
  0x11   : > { %s41_s26 = sadd.s32 1, %s863_s21  ;;  %p39_p0 = scmp.ge.s32.totalorder %s38_s25, 2 }
  0x12   : > { %s58_s27 = sadd.s32 1, %s847_s17  ;;  %p65_p1 = scmp.ne.s32.totalorder %s847_s17, %s843_s16 }
  0x13   : > { %p66_p2 = scmp.eq.s32.totalorder %s867_s22, 0  ;;  %s1247_s25 = smov (%p39_p0, %s38_s25), 0 }
  0x14   : > { %1220 = sst [smem:[#allocation15_spill]] %s1247_s25  ;;  %s1249_s26 = smov (!%p39_p0, %s41_s26), %s863_s21 }
  0x15   : > { %s54_s28 = ssub.s32 %s859_s20, %s1247_s25  ;;  %p961_p3 = por %p66_p2, %p65_p1 }
  0x16   : > { %p43_p4 = scmp.ge.s32.totalorder %s1249_s26, 2  ;;  %p71_p5 = scmp.ne.s32.totalorder %s843_s16, %s839_s15 }
  0x17   : > { %p72_p6 = scmp.eq.s32.totalorder %s514_s23, 0  ;;  %s120_s30 = sadd.s32 1, %s835_s14 }
  0x18   : > { %s1251_s26 = smov (%p43_p4, %s1249_s26), 0  ;;  %p130_p8 = scmp.ne.s32.totalorder %s835_s14, %s831_s13 }
  0x19   : > { %1222 = sst [smem:[#allocation16_spill]] %s1251_s26  ;;  %p969_p7 = por %p72_p6, %p71_p5 }
  0x1a   : > { %s53_s5 = ssub.s32 %s863_s21, %s1251_s26  ;;  %p131_p9 = scmp.eq.s32.totalorder %s514_s23, 3 }
  0x1b   : > { %s1223_s4 = scalar_select %p969_p7, 1, 0 }
  0x1c   : > { %s55_s6 = sor.u32 %s54_s28, %s53_s5  ;;  %p118_p10 = scmp.eq.s32.totalorder %s53_s5, 0 }
  0x1d   : > { %p56_p11 = scmp.eq.s32.totalorder %s55_s6, 0  ;;  %p977_p12 = por %p131_p9, %p130_p8 }
  0x1e   : > { %s982_s8 = scalar_select %p118_p10, %s835_s14, %s120_s30  }
  0x1f   : > { %s1224_s7 = scalar_select %p977_p12, 1, 0 }
  0x20   : > { %s985_s9 = scalar_select %p56_p11, %s847_s17, %s58_s27  }
  0x21   : > { %p136_p13 = scmp.ne.s32.totalorder %s831_s13, %s827_s12  ;;  %p137_p0 = scmp.eq.s32.totalorder %s515_s24, 3 }
  0x22   : > { %p553_p1 = scmp.lt.s32.totalorder %s867_s22, 4  ;;  %s995_s11 = sand.u32 1, %s847_s17  }
  0x23   : > { %p990_p2 = por %p137_p0, %p136_p13  ;;  %s518_s15 = sshll.u32 %s995_s11, 2 }
  0x24   : > { %s519_s23 = sshll.u32 %s863_s21, 1  ;;  %s191_s30 = scalar_lea.vmem [#allocation2], %s518_s15 }
  0x25   : > { %s1225_s10 = scalar_select %p990_p2, 1, 0 }
  0x26   : > { %s1000_s28 = sadd.s32 %s859_s20, %s519_s23  ;;  %s202_s27 = sshll.u32 %s191_s30, 4  ;;  %s1003_s27 = int_to_ptr.vmem [resolvable:$true] %s202_s27 }
  0x27   : > { %s520_s5 = sshll.u32 %s1000_s28, 6  ;;  %s1226_s0 = sld [smem:[#allocation17_spill]] }
  0x28   : > { %p1012_p4 = pnand %p553_p1, %p961_p3  ;;  %s188_s15 = scalar_lea.sflag [#allocation3], %s995_s11 }
  0x2a   : > { %p651_p9 = pneg %p1012_p4 }
  0x2d   : > { %s1008_s26 = scalar_lea.hbm %s1226_s0, %s520_s5  ;;  %s654_s5 = scalar_lea.hbm %s1226_s0, 256 }
  0x2e   : > { %s649_s23 = scalar_lea.hbm %s1008_s26, 64  ;;  %p655_p3 = scmp.lt.u32.totalorder %s1008_s26, %s1226_s0 }
  0x2f   : > { %p650_p8 = scmp.ne.s32.totalorder %s1008_s26, %s649_s23  ;;  %p656_p13 = scmp.lt.u32.totalorder %s654_s5, %s649_s23 }
  0x30   : > { %p658_p1 = scmp.lt.u32.totalorder %s649_s23, %s1008_s26 }
  0x31   : > { %p652_p10 = pnand %p651_p9, %p650_p8  ;;  %p657_p0 = por %p656_p13, %p655_p3 }
  0x33   : > { %p653_p11 = pneg %p652_p10  ;;  %p659_p5 = por %p658_p1, %p657_p0 }
  0x35   : > { %p660_p6 = pnand %p659_p5, %p653_p11 }
  0x37   : > { %663 = shalt.err (!%p660_p6)
}
  0x38   : > { %s664_s21 = scalar_lea.vmem %s1003_s27, 64  ;;  %s869_s29 = smov [#allocation2]  }
  0x39   : > { %p665_p8 = scmp.ne.s32.totalorder %s1003_s27, %s664_s21  ;;  %s669_s30 = sshll.u32 %s869_s29, 4  ;;  %s670_s30 = int_to_ptr.vmem [resolvable:$false] %s669_s30 }
  0x3a   : > { %s671_s24 = scalar_lea.vmem %s670_s30, 128  ;;  %p672_p12 = scmp.lt.s32.totalorder %s1003_s27, %s670_s30 }
  0x3b   : > { %p667_p10 = pnand %p665_p8, %p651_p9  ;;  %p673_p3 = scmp.lt.s32.totalorder %s671_s24, %s664_s21 }
  0x3d   : > { %p668_p2 = pneg %p667_p10  ;;  %p674_p13 = por %p673_p3, %p672_p12 }
  0x3f   : > { %p675_p0 = pnand %p674_p13, %p668_p2 }
  0x41   : > { %678 = shalt.err (!%p675_p0)
}
  0x42   : > { %542 = dma.hbm_to_vmem [thread:$0]  (!%p1012_p4), %s1008_s26, 64, %s1003_s27, %s188_s15  }
  0x43   : > { %p1228_p5 = scmp.lt.s32.totalorder %s867_s22, 5  ;;  %p1229_p6 = scmp.ge.s32.totalorder %s867_s22, 1 }
  0x44   : > { %s522_s21 = sshll.u32 %s1000_s28, 4  ;;  %s212_s5 = scalar_lea.vmem [#allocation5], %s995_s11 }
  0x45   : > { %p1048_p11 = pnand %p1229_p6, %p1228_p5  ;;  %s223_s6 = sshll.u32 %s212_s5, 4  ;;  %s224_s6 = int_to_ptr.vmem [resolvable:$true] %s223_s6 }
  0x46   : > { %s1057_s24 = scalar_lea.hbm %s1210_s1, %s522_s21  ;;  %s210_s26 = scalar_lea.sflag [#allocation6], %s995_s11 }
  0x47   : > { %s1230_s23 = scalar_select %p1048_p11, 1, 0 }
  0x48   : > { %s679_s27 = scalar_lea.hbm %s1057_s24, 16  ;;  %s684_s5 = scalar_lea.hbm %s1210_s1, 64 }
  0x49   : > { %p680_p12 = scmp.ne.s32.totalorder %s1057_s24, %s679_s27  ;;  %p685_p8 = scmp.lt.u32.totalorder %s1057_s24, %s1210_s1 }
  0x4a   : > { %p686_p10 = scmp.lt.u32.totalorder %s684_s5, %s679_s27  ;;  %p688_p13 = scmp.lt.u32.totalorder %s679_s27, %s1057_s24 }
  0x4b   : > { %p682_p2 = pnand %p680_p12, %p651_p9 }
  0x4c   : > { %p687_p3 = por %p686_p10, %p685_p8 }
  0x4d   : > { %p683_p1 = pneg %p682_p2 }
  0x4e   : > { %p689_p0 = por %p688_p13, %p687_p3 }
  0x50   : > { %p690_p5 = pnand %p689_p0, %p683_p1 }
  0x52   : > { %693 = shalt.err (!%p690_p5)
}
  0x53   : > { %s694_s11 = scalar_lea.vmem %s224_s6, 16  ;;  %s870_s21 = smov [#allocation5]  }
  0x54   : > { %p695_p6 = scmp.ne.s32.totalorder %s224_s6, %s694_s11  ;;  %s699_s30 = sshll.u32 %s870_s21, 4  ;;  %s700_s30 = int_to_ptr.vmem [resolvable:$false] %s699_s30 }
  0x55   : > { %s701_s28 = scalar_lea.vmem %s700_s30, 32  ;;  %p702_p7 = scmp.lt.s32.totalorder %s224_s6, %s700_s30 }
  0x56   : > { %p697_p12 = pnand %p695_p6, %p651_p9  ;;  %p703_p11 = scmp.lt.s32.totalorder %s701_s28, %s694_s11 }
  0x58   : > { %p698_p2 = pneg %p697_p12  ;;  %p704_p8 = por %p703_p11, %p702_p7 }
  0x5a   : > { %p705_p10 = pnand %p704_p8, %p698_p2 }
  0x5c   : > { %708 = shalt.err (!%p705_p10)
}
  0x5d   : > { %545 = dma.hbm_to_vmem [thread:$0]  (!%p1012_p4), %s1057_s24, 16, %s224_s6, %s210_s26  }
  0x5e   : > { %p1231_p1 = scmp.ne.s32.totalorder %s1230_s23, 0 }
  0x5f   : > { %s234_s0 = sand.u32 (!%p1231_p1), 1, %s843_s16   ;;  %p1232_p9 = scmp.ne.s32.totalorder (!%p1231_p1), %s1223_s4, 0 }
  0x60   : > { %232 = sbr.rel (%p1231_p1) target bundleno = 207 (0xcf), region = 28  ;;  %s524_s27 = sshll.u32 (!%p1231_p1), %s234_s0, 2 }
  0x61   : > { %s235_s15 = scalar_lea.sflag (!%p1231_p1), [#allocation3], %s234_s0  ;;  %s238_s5 = scalar_lea.vmem (!%p1231_p1), [#allocation2], %s524_s27 }
  0x67   : > { %810 = dma.done.wait (%p1232_p9), %s235_s15, 64  }
  0x68   : > { %812 = vsyncadd (%p1232_p9), %s235_s15, 4294967232  ;;  %s244_s29 = scalar_lea.sflag [#allocation6], %s234_s0  ;;  %s246_s11 = scalar_lea.vmem [#allocation5], %s234_s0 }
  0x69   : > { %814 = dma.done.wait (%p1232_p9), %s244_s29, 16  }
  0x6a   : > { %816 = vsyncadd (%p1232_p9), %s244_s29, 4294967280  ;;  %s1091_s25 = sand.u32 1, %s831_s13   ;;  %p525_p7 = scmp.ne.s32.totalorder %s851_s18, 0 }
  0x6b   : > { %s1094_s23 = scalar_lea.vmem [#allocation7], %s1091_s25  ;;  %s275_s6 = scalar_lea.vmem [#allocation8], %s1091_s25  ;;  %v871_v0 = vmov (!%p525_p7), 0.0  }
  0x6c   : > { %287 = sbr.rel (%p525_p7) target bundleno = 115 (0x73), region = 40  ;;  %288 = vst [vmem:[%s1094_s23] sm:$0x1] (!%p525_p7), %v871_v0  ;;  %289 = vst [vmem:[%s275_s6] sm:$0x1] (!%p525_p7), %v871_v0 }
  0x73 PF: > { %v290_v1 = vld [vmem:[%s238_s5] sm:$0xf]  ;;  %vm293_vm0 = vcmask 1043456   ;;  %v872_v6 = vmov 0.0   ;;  %s527_s18 = sshll.u32 %s855_s19, 4  ;;  %s374_s21 = sshll.u32 %s275_s6, 4  ;;  %s375_s21 = int_to_ptr.vmem [resolvable:$true] %s374_s21 }
  0x74   : > { %v1099_v2 = vld [vmem:[%s246_s11] sm:$0x1]  ;;  %v294_v3 = vsel %vm293_vm0, %v290_v1, -inf  ;;  %s1111_s26 = scalar_lea.hbm %s1212_s3, %s527_s18  ;;  %s345_s30 = scalar_lea.sflag [#allocation9], %s1091_s25 }
  0x75   : > { %vm292_vm1 = vcmp.ne.s32.totalorder %v1099_v2, 255  ;;  %v337_v4 = vld [vmem:[%s275_s6] sm:$0x1]  ;;  %v295_v5 = vrot.slane %v294_v3, 4  ;;  %s709_s28 = scalar_lea.vmem %s375_s21, 16  ;;  %p1233_p11 = scmp.ne.s32.totalorder %s1224_s7, 0 }
  0x76   : > { %v526_v7 = vsel %vm292_vm1, 1.0, %v872_v6  ;;  %p710_p4 = scmp.ne.s32.totalorder %s375_s21, %s709_s28  ;;  %s873_s0 = smov [#allocation8]  }
  0x77   : > { %v338_v8 = vadd.f32 %v526_v7, %v337_v4  ;;  %v296_v9 = vmax.f32 %v294_v3, %v295_v5  ;;  %s713_s27 = sshll.u32 %s873_s0, 4  ;;  %s714_s27 = int_to_ptr.vmem [resolvable:$false] %s713_s27 }
  0x78   : > { %p711_p3 = pnand %p710_p4, %p1233_p11  ;;  %s715_s15 = scalar_lea.vmem %s714_s27, 32 }
  0x79   : > { %339 = vst [vmem:[%s275_s6] sm:$0x1] %v338_v8  ;;  %v297_v10 = vrot.slane %v296_v9, 2  ;;  %p716_p0 = scmp.lt.s32.totalorder %s375_s21, %s714_s27  ;;  %p717_p5 = scmp.lt.s32.totalorder %s715_s15, %s709_s28 }
  0x7a   : > { %p712_p13 = pneg %p711_p3 }
  0x7b   : > { %p718_p6 = por %p717_p5, %p716_p0 }
  0x7d   : > { %p719_p12 = pnand %p718_p6, %p712_p13 }
  0x7f   : > { %722 = shalt.err (!%p719_p12)
}
  0x80   : > { %s723_s5 = scalar_lea.hbm %s1111_s26, 16  ;;  %s727_s6 = scalar_lea.hbm %s1212_s3, 32 }
  0x81   : > { %p724_p2 = scmp.ne.s32.totalorder %s1111_s26, %s723_s5  ;;  %p728_p1 = scmp.lt.u32.totalorder %s1111_s26, %s1212_s3 }
  0x82   : > { %p729_p9 = scmp.lt.u32.totalorder %s727_s6, %s723_s5  ;;  %p731_p4 = scmp.lt.u32.totalorder %s723_s5, %s1111_s26 }
  0x83   : > { %p725_p8 = pnand %p724_p2, %p1233_p11 }
  0x84   : > { %p730_p7 = por %p729_p9, %p728_p1 }
  0x85   : > { %p726_p10 = pneg %p725_p8 }
  0x86   : > { %p732_p3 = por %p731_p4, %p730_p7 }
  0x88   : > { %p733_p13 = pnand %p732_p3, %p726_p10 }
  0x8a   : > { %736 = shalt.err (!%p733_p13)
}
  0x8b   : > { %536 = dma.vmem_to_hbm [thread:$0]  (%p1233_p11), %s375_s21, 16, %s1111_s26, %s345_s30   ;;  %v298_v11 = vmax.f32 %v296_v9, %v297_v10  ;;  %v314_v12 = vlaneseq  ;;  %v316_v19 = vsel %vm292_vm1, %v1099_v2, 0  ;;  %v334_v41 = vld [vmem:[%s1094_s23] sm:$0x1] }
  0x8c   : > { %s359_s26 = sshll.u32 %s1094_s23, 4  ;;  %s1145_s28 = scalar_lea.hbm %s1211_s2, %s527_s18  ;;  %s1147_s26 = int_to_ptr.vmem [resolvable:$true] %s359_s26 }
  0x8d   : > { %v299_v13 = vrot.slane %v298_v11, 1  ;;  %v315_v15 = vshrl.u32 %v314_v12, 7  ;;  %s341_s0 = scalar_lea.sflag [#allocation4], %s1091_s25  ;;  %s737_s27 = scalar_lea.vmem %s1147_s26, 16 }
  0x8e   : > { %p738_p0 = scmp.ne.s32.totalorder %s1147_s26, %s737_s27  ;;  %s874_s15 = smov [#allocation7]  }
  0x8f   : > { %v300_v14 = vmax.f32 %v298_v11, %v299_v13  ;;  %v319_v18 = vsub.s32 0, %v315_v15  ;;  %s741_s5 = sshll.u32 %s874_s15, 4  ;;  %s742_s5 = int_to_ptr.vmem [resolvable:$false] %s741_s5 }
  0x90   : > { %p739_p5 = pnand %p738_p0, %p1233_p11  ;;  %s743_s19 = scalar_lea.vmem %s742_s5, 32 }
  0x91   : > { %v301_v16 = vsub.f32 %v290_v1, %v300_v14  ;;  %v320_v20 = vrot.slane %v316_v19, %v319_v18  ;;  %p744_p12 = scmp.lt.s32.totalorder %s1147_s26, %s742_s5  ;;  %p745_p2 = scmp.lt.s32.totalorder %s743_s19, %s737_s27 }
  0x92   : > { %p740_p6 = pneg %p739_p5 }
  0x93   : > { %v302_v17 = vmul.f32 1.442695, %v301_v16  ;;  %vm321_vm2 = vcmp.eq.s32.totalorder %v315_v15, %v320_v20  ;;  %p746_p8 = por %p745_p2, %p744_p12 }
  0x94   : > { %v322_v21 = vsel %vm321_vm2, %v290_v1, 0.0 }
  0x95   : > { %645 = vpow2.f32 %v302_v17  ;;  %v323_v25 = vsel %vm293_vm0, %v322_v21, 0.0  ;;  %p747_p10 = pnand %p746_p8, %p740_p6 }
  0x96   : > { %v324_v27 = vrot.slane %v323_v25, 4 }
  0x98   : > { %v325_v30 = vadd.f32 %v324_v27, %v323_v25 }
  0x9a   : > { %v326_v33 = vrot.slane %v325_v30, 2 }
  0x9c   : > { %v327_v34 = vadd.f32 %v326_v33, %v325_v30 }
  0x9e   : > { %v328_v35 = vrot.slane %v327_v34, 1 }
  0x9f   : > { %v646_v22 = vpop.eup %645 }
  0xa0   : > { %v304_v23 = vsel %vm293_vm0, %v646_v22, 0.0  ;;  %v329_v38 = vadd.f32 %v328_v35, %v327_v34 }
  0xa1   : > { %v305_v24 = vrot.slane %v304_v23, 4 }
  0xa3   : > { %v306_v26 = vadd.f32 %v305_v24, %v304_v23 }
  0xa5   : > { %v307_v28 = vrot.slane %v306_v26, 2 }
  0xa7   : > { %v308_v29 = vadd.f32 %v307_v28, %v306_v26 }
  0xa9   : > { %v309_v31 = vrot.slane %v308_v29, 1 }
  0xab   : > { %v310_v32 = vadd.f32 %v309_v31, %v308_v29 }
  0xad   : > { %647 = vlog2.f32 %v310_v32 }
  0xb7   : > { %v648_v36 = vpop.eup %647 }
  0xb8   : > { %v312_v37 = vmul.f32 0.6931472, %v648_v36 }
  0xba   : > { %v313_v39 = vadd.f32 %v312_v37, %v300_v14 }
  0xbc   : > { %v330_v40 = vsub.f32 %v313_v39, %v329_v38 }
  0xbe   : > { %v331_v42 = vsel %vm292_vm1, %v330_v40, 0.0 }
  0xbf   : > { %v335_v43 = vadd.f32 %v334_v41, %v331_v42 }
  0xc1   : > { %336 = vst [vmem:[%s1094_s23] sm:$0x1] %v335_v43 }
  0xc2   : > { %750 = shalt.err (!%p747_p10)
}
  0xc3   : > { %s751_s25 = scalar_lea.hbm %s1145_s28, 16  ;;  %s755_s29 = scalar_lea.hbm %s1211_s2, 32 }
  0xc4   : > { %p752_p1 = scmp.ne.s32.totalorder %s1145_s28, %s751_s25  ;;  %p756_p4 = scmp.lt.u32.totalorder %s1145_s28, %s1211_s2 }
  0xc5   : > { %p757_p3 = scmp.lt.u32.totalorder %s755_s29, %s751_s25  ;;  %p759_p0 = scmp.lt.u32.totalorder %s751_s25, %s1145_s28 }
  0xc6   : > { %p753_p9 = pnand %p752_p1, %p1233_p11 }
  0xc7   : > { %p758_p13 = por %p757_p3, %p756_p4 }
  0xc8   : > { %p754_p7 = pneg %p753_p9 }
  0xc9   : > { %p760_p5 = por %p759_p0, %p758_p13 }
  0xcb   : > { %p761_p6 = pnand %p760_p5, %p754_p7 }
  0xcd   : > { %764 = shalt.err (!%p761_p6)
}
  0xce   : > { %535 = dma.vmem_to_hbm [thread:$0]  (%p1233_p11), %s1147_s26, 16, %s1145_s28, %s341_s0  }
  0xcf PF: > { %p554_p12 = scmp.ge.s32.totalorder %s867_s22, 2  ;;  %s386_s4 = sand.u32 1, %s827_s12  }
  0xd0   : > { %p1234_p2 = scmp.ne.s32.totalorder %s1225_s10, 0  ;;  %s387_s24 = scalar_lea.sflag [#allocation4], %s386_s4 }
  0xd2   : > { %p547_p8 = pnand %p554_p12, %p1234_p2 }
  0xd4   : > { %818 = dma.done.wait (!%p547_p8), %s387_s24, 16  }
  0xd5   : > { %820 = vsyncadd (!%p547_p8), %s387_s24, 4294967280  ;;  %s395_s21 = scalar_lea.sflag [#allocation9], %s386_s4 }
  0xd6   : > { %822 = dma.done.wait (!%p547_p8), %s395_s21, 16  }
  0xd7   : > { %824 = vsyncadd (!%p547_p8), %s395_s21, 4294967280  ;;  %s26_s22 = sadd.s32 1, %s867_s22   ;;  %s1235_s19 = sld [smem:[#allocation14_spill]] }
  0xd8   : > { %p23_p10 = scmp.ge.s32.totalorder %s26_s22, 6   ;;  %s1236_s7 = sld [smem:[#allocation15_spill]] }
  0xd9   : > { %s1237_s21 = sld [smem:[#allocation16_spill]]  ;;  %s1238_s12 = smov %s831_s13 }
  0xda   : > { %s1239_s13 = smov %s835_s14  ;;  %s1240_s14 = smov %s982_s8 }
  0xdb   : > { %s1241_s15 = smov %s843_s16  ;;  %s1242_s16 = smov %s847_s17 }
  0xdc   : > { %s1243_s17 = smov %s985_s9  ;;  %s1244_s18 = smov %s859_s20 }
  0xdd   :  { %25 = sbr.rel (!%p23_p10) target bundleno = 15 (0xf), region = 107 }
  0xde   : > { %s1245_s20 = smov %s1236_s7 }
  0xe4   :  { %399 = vsyncpa [#allocation3], 1 }
  0xe5   :  { %401 = vsyncpa [#allocation3 + $0x1], 1 }
  0xe6   :  { %402 = vsyncpa [#allocation6], 1 }
  0xe7   :  { %404 = vsyncpa [#allocation6 + $0x1], 1 }
  0xe8   :  { %405 = vsyncpa [#allocation4], 1 }
  0xe9   :  { %407 = vsyncpa [#allocation4 + $0x1], 1 }
  0xea   :  { %408 = vsyncpa [#allocation9], 1 }
  0xeb   :  { %410 = vsyncpa [#allocation9 + $0x1], 1 }

</bundles_post_ra>
